<compile_context>
chip_gen: v7x
topology: tpu7x:2x2x1
jax: 0.10.0
libtpu: 0.0.40
codegen_flags: <defaults>
</compile_context>

<pallas_src>
import functools

import jax
import jax.numpy as jnp
from jax import lax
from jax.experimental import pallas as pl
from jax.experimental.pallas import tpu as pltpu


def _round_up(n, m):
    return ((n + m - 1) // m) * m


def mlp_kernel(x_ref, w1_ref, b1_ref, w2_ref, b2_ref, o_ref):
    # net1: Linear(10, 10) — f32 MXU dot, f32 accumulation.
    h = jnp.dot(x_ref[...], w1_ref[...],
                preferred_element_type=jnp.float32,
                precision=lax.Precision.HIGHEST)
    # bias + ReLU (VPU, free on a DMA-bound kernel).
    h = jnp.maximum(h + b1_ref[...], 0.0)
    # net2: Linear(10, 5) — narrow output, stored directly (masked vst on 5 lanes).
    y = jnp.dot(h, w2_ref[...],
                preferred_element_type=jnp.float32,
                precision=lax.Precision.HIGHEST)
    o_ref[...] = (y + b2_ref[...]).astype(o_ref.dtype)


@functools.partial(jax.jit, static_argnames=("block_b",))
def simple_model_forward(x, w1, b1, w2, b2, *, block_b=4096):
    """x: (B, 10) f32; w1: (10, 10) [in,out]; b1: (1, 10); w2: (10, 5) [in,out]; b2: (1, 5).

    Returns (B, 5) f32, equivalent to PyTorch net2(relu(net1(x))).
    """
    B, in_f = x.shape
    hid = w1.shape[1]
    out_f = w2.shape[1]

    # Batch tile: multiple of 8 (sublane), capped by block_b.  No wrapper-side
    # padding: pl.cdiv lets Pallas handle a ragged trailing block, and rows of
    # that block beyond B are simply never written back (out_shape is (B, 5)).
    Bt = min(block_b, _round_up(B, 8))
    grid = (pl.cdiv(B, Bt),)

    return pl.pallas_call(
        mlp_kernel,
        out_shape=jax.ShapeDtypeStruct((B, out_f), jnp.float32),
        grid=grid,
        in_specs=[
            pl.BlockSpec((Bt, in_f), lambda i: (i, 0)),    # x: streamed per batch tile
            pl.BlockSpec((in_f, hid), lambda i: (0, 0)),   # w1: VMEM-resident
            pl.BlockSpec((1, hid), lambda i: (0, 0)),      # b1: VMEM-resident
            pl.BlockSpec((hid, out_f), lambda i: (0, 0)),  # w2: VMEM-resident
            pl.BlockSpec((1, out_f), lambda i: (0, 0)),    # b2: VMEM-resident
        ],
        out_specs=pl.BlockSpec((Bt, out_f), lambda i: (i, 0)),
        compiler_params=pltpu.CompilerParams(
            # Batch tiles are independent: shard across the 2 TCs on v7x.
            dimension_semantics=("parallel",)),
    )(x, w1, b1, w2, b2)


def init_params(key, dtype=jnp.float32):
    """Deterministic init mimicking nn.Linear's uniform(-1/sqrt(fan_in), 1/sqrt(fan_in))."""
    k1, k2, k3, k4 = jax.random.split(key, 4)
    bound1 = 1.0 / jnp.sqrt(10.0)
    bound2 = 1.0 / jnp.sqrt(10.0)
    # Stored as [in_features, out_features] (pre-transposed vs PyTorch's [out,in]).
    w1 = jax.random.uniform(k1, (10, 10), dtype, minval=-bound1, maxval=bound1)
    b1 = jax.random.uniform(k2, (1, 10), dtype, minval=-bound1, maxval=bound1)
    w2 = jax.random.uniform(k3, (10, 5), dtype, minval=-bound2, maxval=bound2)
    b2 = jax.random.uniform(k4, (1, 5), dtype, minval=-bound2, maxval=bound2)
    return w1, b1, w2, b2


if __name__ == "__main__":
    key = jax.random.PRNGKey(0)
    kx, kp = jax.random.split(key)

    batch = 8
    x = jax.random.normal(kx, (batch, 10), dtype=jnp.float32)
    w1, b1, w2, b2 = init_params(kp)

    out = simple_model_forward(x, w1, b1, w2, b2)
    out = jax.block_until_ready(out)

    # Pure-JAX f32 reference (matches the PyTorch f32 forward pass).
    h_ref = jnp.maximum(x @ w1 + b1, 0.0)
    ref = h_ref @ w2 + b2

    assert out.shape == (batch, 5)
    assert jnp.allclose(out, ref, atol=1e-4, rtol=1e-4)

    print("KERNEL_OK")
</pallas_src>

<mosaic_0001>
module attributes {stable_mosaic.version = 11 : i64} {
  func.func @mlp_kernel(%arg0: i32, %arg1: memref<8x10xf32, #tpu.memory_space<vmem>>, %arg2: memref<10x10xf32, #tpu.memory_space<vmem>>, %arg3: memref<1x10xf32, #tpu.memory_space<vmem>>, %arg4: memref<10x5xf32, #tpu.memory_space<vmem>>, %arg5: memref<1x5xf32, #tpu.memory_space<vmem>>, %arg6: memref<8x5xf32, #tpu.memory_space<vmem>>) attributes {dimension_semantics = [#tpu.dimension_semantics<parallel>], iteration_bounds = array<i64: 1>, scalar_prefetch = 0 : i64, scratch_operands = 0 : i64, tpu.core_type = #tpu.core_type<tc>, window_params = [{transform_indices = @transform_0, window_bounds = array<i64: 8, 10>}, {pipeline_mode = #tpu.pipeline_mode<synchronous>, transform_indices = @transform_1, window_bounds = array<i64: 10, 10>}, {pipeline_mode = #tpu.pipeline_mode<synchronous>, transform_indices = @transform_2, window_bounds = array<i64: 1, 10>}, {pipeline_mode = #tpu.pipeline_mode<synchronous>, transform_indices = @transform_3, window_bounds = array<i64: 10, 5>}, {pipeline_mode = #tpu.pipeline_mode<synchronous>, transform_indices = @transform_4, window_bounds = array<i64: 1, 5>}, {transform_indices = @transform_5, window_bounds = array<i64: 8, 5>}]} {
    %c0 = arith.constant 0 : index
    %c0_0 = arith.constant 0 : index
    %0 = vector.load %arg1[%c0, %c0_0] : memref<8x10xf32, #tpu.memory_space<vmem>>, vector<8x10xf32>
    %c0_1 = arith.constant 0 : index
    %c0_2 = arith.constant 0 : index
    %1 = vector.load %arg2[%c0_1, %c0_2] : memref<10x10xf32, #tpu.memory_space<vmem>>, vector<10x10xf32>
    %cst = arith.constant dense<0.000000e+00> : vector<8x10xf32>
    %2 = tpu.matmul %0, %1, %cst {dimension_numbers = #tpu.dot_dimension_numbers<[1], [0], [0], [1], [0, 0, 1, 1], [], []>, precision = #tpu.contract_precision<fp32>} : vector<8x10xf32>, vector<10x10xf32>, vector<8x10xf32> -> vector<8x10xf32>
    %c0_3 = arith.constant 0 : index
    %c0_4 = arith.constant 0 : index
    %3 = vector.load %arg3[%c0_3, %c0_4] : memref<1x10xf32, #tpu.memory_space<vmem>>, vector<1x10xf32>
    %4 = vector.broadcast %3 : vector<1x10xf32> to vector<8x10xf32>
    %5 = arith.addf %2, %4 : vector<8x10xf32>
    %cst_5 = arith.constant 0.000000e+00 : f32
    %6 = vector.broadcast %cst_5 : f32 to vector<8x10xf32>
    %7 = arith.maximumf %5, %6 : vector<8x10xf32>
    %c0_6 = arith.constant 0 : index
    %c0_7 = arith.constant 0 : index
    %8 = vector.load %arg4[%c0_6, %c0_7] : memref<10x5xf32, #tpu.memory_space<vmem>>, vector<10x5xf32>
    %cst_8 = arith.constant dense<0.000000e+00> : vector<8x5xf32>
    %9 = tpu.matmul %7, %8, %cst_8 {dimension_numbers = #tpu.dot_dimension_numbers<[1], [0], [0], [1], [0, 0, 1, 1], [], []>, precision = #tpu.contract_precision<fp32>} : vector<8x10xf32>, vector<10x5xf32>, vector<8x5xf32> -> vector<8x5xf32>
    %c0_9 = arith.constant 0 : index
    %c0_10 = arith.constant 0 : index
    %10 = vector.load %arg5[%c0_9, %c0_10] : memref<1x5xf32, #tpu.memory_space<vmem>>, vector<1x5xf32>
    %11 = vector.broadcast %10 : vector<1x5xf32> to vector<8x5xf32>
    %12 = arith.addf %9, %11 : vector<8x5xf32>
    %c0_11 = arith.constant 0 : index
    %c0_12 = arith.constant 0 : index
    %13 = vector.load %arg6[%c0_11, %c0_12] : memref<8x5xf32, #tpu.memory_space<vmem>>, vector<8x5xf32>
    tpu.vector_store %arg6[%c0_11, %c0_12], %12 {strides = array<i32>} : memref<8x5xf32, #tpu.memory_space<vmem>>, vector<8x5xf32>,
    return
  }
  func.func @transform_0(%arg0: i32) -> (i32, i32) {
    %c0_i32 = arith.constant 0 : i32
    %c0_i32_0 = arith.constant 0 : i32
    return %arg0, %c0_i32 : i32, i32
  }
  func.func @transform_1(%arg0: i32) -> (i32, i32) {
    %c0_i32 = arith.constant 0 : i32
    %c0_i32_0 = arith.constant 0 : i32
    %c0_i32_1 = arith.constant 0 : i32
    return %c0_i32, %c0_i32_0 : i32, i32
  }
  func.func @transform_2(%arg0: i32) -> (i32, i32) {
    %c0_i32 = arith.constant 0 : i32
    %c0_i32_0 = arith.constant 0 : i32
    %c0_i32_1 = arith.constant 0 : i32
    return %c0_i32, %c0_i32_0 : i32, i32
  }
  func.func @transform_3(%arg0: i32) -> (i32, i32) {
    %c0_i32 = arith.constant 0 : i32
    %c0_i32_0 = arith.constant 0 : i32
    %c0_i32_1 = arith.constant 0 : i32
    return %c0_i32, %c0_i32_0 : i32, i32
  }
  func.func @transform_4(%arg0: i32) -> (i32, i32) {
    %c0_i32 = arith.constant 0 : i32
    %c0_i32_0 = arith.constant 0 : i32
    %c0_i32_1 = arith.constant 0 : i32
    return %c0_i32, %c0_i32_0 : i32, i32
  }
  func.func @transform_5(%arg0: i32) -> (i32, i32) {
    %c0_i32 = arith.constant 0 : i32
    %c0_i32_0 = arith.constant 0 : i32
    return %arg0, %c0_i32 : i32, i32
  }
}

</mosaic_0001>

<bundles_post_ra>
// kernel: simple_model_forward.1
= control target key start
LH: loop header
LB: loop body
LE: loop exit
PB: predicated region body
PF: predicated region fallthrough
CT: control target
= control target key end

     0   :  { %vm35_vm0 = vcmask 1041408   ;;  %v1197_v2 = vmov 0.0|0.0   ;;  %vm31_vm1 = vcmask 80896   ;;  %vm1198_vm2 = vmmov 0   ;;  %s1304_s0 = inlined_call_operand.vmem [shape: f32[8,10], index: 0, kind: input, shape index: {}]   ;;  %s1305_s1 = inlined_call_operand.vmem [shape: f32[10,10], index: 1, kind: input, shape index: {}]   ;;  %s1306_s2 = inlined_call_operand.vmem [shape: f32[1,10], index: 2, kind: input, shape index: {}]   ;;  %s1307_s3 = inlined_call_operand.vmem [shape: f32[10,5], index: 3, kind: input, shape index: {}]   ;;  %s1308_s4 = inlined_call_operand.vmem [shape: f32[1,5], index: 4, kind: input, shape index: {}]   ;;  %s1309_s5 = inlined_call_operand.hbm [shape: f32[8,5], index: 5, kind: output, shape index: {}]  }
   0x1   :  { %v22_v0 = vld [vmem:[%s1305_s1] sm:$0xff]  ;;  %v23_v1 = vld [vmem:[%s1305_s1 + $0x8] sm:$0x3]  ;;  %1111 = vmatprep.subr.bf16.mxu0 %v1197_v2  ;;  %1129 = vmatprep.subr.bf16.mxu1 %v1197_v2  ;;  %v1199_v7 = vmov 0.0  }
   0x2   :  { %v37_v3 = vsel %vm35_vm0, %v23_v1, 0  ;;  %v40_v4 = vand.u32 4294901760, %v22_v0  ;;  %v21_v5 = vld [vmem:[%s1304_s0] sm:$0xff]  ;;  %1031 = vmatprep.mubr.msk.f32.mxu0 %vm1198_vm2, %v1199_v7  ;;  %1073 = vmatprep.mubr.msk.f32.mxu1 %vm1198_vm2, %v1199_v7 }
   0x3   :  { %v43_v6 = vand.u32 4294901760, %v37_v3  ;;  %v33_v8 = vsel %vm31_vm1, %v21_v5, 0 }
   0x4   :  { %10 = vsyncpa [#allocation3], 0  ;;  %v118_v9 = vsub.f32 %v22_v0, %v40_v4  ;;  %v106_v10 = vand.u32 4294901760, %v33_v8  ;;  %v500_v26 = vld [vmem:[%s1307_s3 + $0x8] sm:$0x3]  ;;  %v499_v27 = vld [vmem:[%s1307_s3] sm:$0xff] }
   0x5   :  { %v1112_v11 = vpack.c.bf16 %v43_v6, %v40_v4  ;;  %v125_v12 = vsub.f32 %v37_v3, %v43_v6  ;;  %v512_v28 = vsel %vm35_vm0, %v500_v26, 0  ;;  %v515_v29 = vand.u32 4294901760, %v499_v27  ;;  %v989_v43 = vld [vmem:[%s1306_s2] ss:$0 sm:$0xff]  ;;  %s1200_s28 = smov [#allocation2]  }
   0x6   :  { %v107_v13 = vsub.f32 %v33_v8, %v106_v10  ;;  %v119_v14 = vand.u32 4294901760, %v118_v9  ;;  %v518_v30 = vand.u32 4294901760, %v512_v28  ;;  %v990_v54 = vld [vmem:[%s1308_s4] ss:$0 sm:$0xff]  ;;  %s981_s29 = sshll.u32 %s1200_s28, 4  ;;  %vm973_vm3 = vcmask 39936   ;;  %s982_s29 = int_to_ptr.vmem [resolvable:$true] %s981_s29 }
   0x7   :  { %1113 = vmatpush3.bf16.msra.mxu0 %v1112_v11  ;;  %v126_v15 = vand.u32 4294901760, %v125_v12  ;;  %v1118_v24 = vpack.c.bf16 %v125_v12, %v118_v9  ;;  %v593_v32 = vsub.f32 %v499_v27, %v515_v29  ;;  %s1173_s30 = scalar_lea.vmem %s982_s29, 128  ;;  %p1178_p1 = scmp.lt.s32.totalorder %s982_s29, %s982_s29 }
   0x8   :  { %v108_v16 = vand.u32 4294901760, %v107_v13  ;;  %1114 = vmatprep.subr.bf16.mxu0 %v1197_v2  ;;  %v120_v17 = vsub.f32 %v118_v9, %v119_v14  ;;  %v1130_v31 = vpack.c.bf16 %v518_v30, %v515_v29  ;;  %v600_v33 = vsub.f32 %v512_v28, %v518_v30  ;;  %p1174_p0 = scmp.ne.s32.totalorder %s982_s29, %s1173_s30  ;;  %p1179_p2 = scmp.lt.s32.totalorder %s1173_s30, %s1173_s30 }
   0x9   :  { %v127_v18 = vsub.f32 %v125_v12, %v126_v15  ;;  %v1124_v25 = vpack.c.bf16 %v126_v15, %v119_v14  ;;  %v594_v34 = vand.u32 4294901760, %v593_v32 }
   0xa   :  { %v109_v19 = vsub.f32 %v107_v13, %v108_v16  ;;  %v121_v20 = vand.u32 4294901760, %v120_v17  ;;  %1131 = vmatpush3.bf16.msra.mxu1 %v1130_v31  ;;  %v601_v35 = vand.u32 4294901760, %v600_v33  ;;  %v1136_v41 = vpack.c.bf16 %v600_v33, %v593_v32  ;;  %p1180_p3 = por %p1179_p2, %p1178_p1 }
   0xb   :  { %v128_v21 = vand.u32 4294901760, %v127_v18  ;;  %1132 = vmatprep.subr.bf16.mxu1 %v1197_v2  ;;  %v595_v36 = vsub.f32 %v593_v32, %v594_v34 }
   0xc   :  { %v110_v22 = vand.u32 4294901760, %v109_v19  ;;  %v602_v37 = vsub.f32 %v600_v33, %v601_v35  ;;  %v1142_v42 = vpack.c.bf16 %v601_v35, %v594_v34  ;;  %p1181_p4 = pnand %p1180_p3, %p1174_p0 }
   0xd   :  { %v1115_v23 = vpack.c.bf16 %v128_v21, %v121_v20  ;;  %v596_v38 = vand.u32 4294901760, %v595_v36 }
   0xe   :  { %1032 = vmatmul.mubr.f32.vlgmr.msra.gmra.mrb[0].mxu0 %v110_v22  ;;  %v603_v39 = vand.u32 4294901760, %v602_v37 }
   0xf   :  { %1116 = vmatpush3.bf16.msra.mxu0 %v1115_v23  ;;  %1038 = vmatprep.mubr.msk.f32.mxu0 %vm1198_vm2, %v1199_v7 }
  0x10   :  { %1117 = vmatprep.subr.bf16.mxu0 %v1197_v2  ;;  %v1133_v40 = vpack.c.bf16 %v603_v39, %v596_v38 }
  0x16   :  { %1039 = vmatmul.mubr.f32.vlgmr.msra.gmra.mrb[0].mxu0 %v106_v10 }
  0x17   :  { %1119 = vmatpush3.bf16.msra.mxu0 %v1118_v24  ;;  %1045 = vmatprep.mubr.msk.f32.mxu0 %vm1198_vm2, %v1199_v7 }
  0x18   :  { %1120 = vmatprep.subr.bf16.mxu0 %v1197_v2 }
  0x1e   :  { %1046 = vmatmul.mubr.f32.vlgmr.msra.gmra.mrb[0].mxu0 %v107_v13 }
  0x1f   :  { %1122 = vmatpush3.bf16.msra.mxu0 %v1112_v11  ;;  %1052 = vmatprep.mubr.msk.f32.mxu0 %vm1198_vm2, %v1199_v7 }
  0x20   :  { %1123 = vmatprep.subr.bf16.mxu0 %v1197_v2 }
  0x26   :  { %1053 = vmatmul.mubr.f32.vlgmr.msra.gmra.mrb[0].mxu0 %v108_v16 }
  0x27   :  { %1125 = vmatpush3.bf16.msra.mxu0 %v1124_v25  ;;  %1059 = vmatprep.mubr.msk.f32.mxu0 %vm1198_vm2, %v1199_v7 }
  0x28   :  { %1126 = vmatprep.subr.bf16.mxu0 %v1197_v2 }
  0x2e   :  { %1060 = vmatmul.mubr.f32.vlgmr.msra.gmra.mrb[0].mxu0 %v106_v10 }
  0x2f   :  { %1128 = vmatpush3.bf16.msra.mxu0 %v1112_v11  ;;  %1066 = vmatprep.mubr.msk.f32.mxu0 %vm1198_vm2, %v1199_v7 }
  0x36   :  { %1067 = vmatmul.mubr.f32.vlgmr.msra.gmra.mrb[0].mxu0 %v106_v10 }
 0x109   :  { %v494_v44 = vpop.f32.mrb[0].mxu0 }
 0x10a   :  { %v1147_v45 = vadd.f32 %v989_v43, %v494_v44  ;;  %v1068_v46 = vpop.f32.mrb[1].mxu0 }
 0x10c   :  { %v498_v47 = vmax.f32 %v1147_v45, 0.0 }
 0x10e   :  { %v509_v48 = vsel %vm31_vm1, %v498_v47, 0 }
 0x10f   :  { %v581_v49 = vand.u32 4294901760, %v509_v48 }
 0x111   :  { %v582_v50 = vsub.f32 %v509_v48, %v581_v49 }
 0x113   :  { %v583_v51 = vand.u32 4294901760, %v582_v50 }
 0x115   :  { %v584_v52 = vsub.f32 %v582_v50, %v583_v51 }
 0x117   :  { %v585_v53 = vand.u32 4294901760, %v584_v52 }
 0x119   :  { %1074 = vmatmul.mubr.f32.vlgmr.msra.gmra.mrb[0].mxu1 %v585_v53 }
 0x11a   :  { %1134 = vmatpush3.bf16.msra.mxu1 %v1133_v40  ;;  %1080 = vmatprep.mubr.msk.f32.mxu1 %vm1198_vm2, %v1199_v7 }
 0x11b   :  { %1135 = vmatprep.subr.bf16.mxu1 %v1197_v2 }
 0x121   :  { %1081 = vmatmul.mubr.f32.vlgmr.msra.gmra.mrb[0].mxu1 %v581_v49 }
 0x122   :  { %1137 = vmatpush3.bf16.msra.mxu1 %v1136_v41  ;;  %1087 = vmatprep.mubr.msk.f32.mxu1 %vm1198_vm2, %v1199_v7 }
 0x123   :  { %1138 = vmatprep.subr.bf16.mxu1 %v1197_v2 }
 0x129   :  { %1088 = vmatmul.mubr.f32.vlgmr.msra.gmra.mrb[0].mxu1 %v582_v50 }
 0x12a   :  { %1140 = vmatpush3.bf16.msra.mxu1 %v1130_v31  ;;  %1094 = vmatprep.mubr.msk.f32.mxu1 %vm1198_vm2, %v1199_v7 }
 0x12b   :  { %1141 = vmatprep.subr.bf16.mxu1 %v1197_v2 }
 0x131   :  { %1095 = vmatmul.mubr.f32.vlgmr.msra.gmra.mrb[0].mxu1 %v583_v51 }
 0x132   :  { %1143 = vmatpush3.bf16.msra.mxu1 %v1142_v42  ;;  %1101 = vmatprep.mubr.msk.f32.mxu1 %vm1198_vm2, %v1199_v7 }
 0x133   :  { %1144 = vmatprep.subr.bf16.mxu1 %v1197_v2 }
 0x139   :  { %1102 = vmatmul.mubr.f32.vlgmr.msra.gmra.mrb[0].mxu1 %v581_v49 }
 0x13a   :  { %1146 = vmatpush3.bf16.msra.mxu1 %v1130_v31  ;;  %1108 = vmatprep.mubr.msk.f32.mxu1 %vm1198_vm2, %v1199_v7 }
 0x141   :  { %1109 = vmatmul.mubr.f32.vlgmr.msra.gmra.mrb[0].mxu1 %v581_v49 }
 0x214   :  { %v969_v55 = vpop.f32.mrb[0].mxu1 }
 0x215   :  { %v1148_v56 = vadd.f32 %v990_v54, %v969_v55  ;;  %v1110_v57 = vpop.f32.mrb[1].mxu1 }
 0x217   :  { %974 = vst.msk [vmem:[#allocation2] sm:$0xff] %vm973_vm3, %v1148_v56 }
 0x218   :  { %1184 = shalt.err (!%p1181_p4)
}
 0x219   :  { %s1185_s8 = scalar_lea.hbm %s1309_s5, 128 }
 0x21a   :  { %p1186_p5 = scmp.ne.s32.totalorder %s1309_s5, %s1185_s8  ;;  %p1189_p6 = scmp.lt.u32.totalorder %s1185_s8, %s1309_s5 }
 0x21c   :  { %p1191_p7 = pnand %p1189_p6, %p1186_p5 }
 0x21e   :  { %1194 = shalt.err (!%p1191_p7)
}
 0x21f   :  { %984 = dma.vmem_to_hbm [thread:$0]  %s982_s29, 128, %s1309_s5, [#allocation3]  }
 0x220   :  { %1195 = dma.done.wait [#allocation3], 128  }
 0x221   :  { %1196 = vsyncadd [#allocation3], 4294967168 }
 0x222   :  { %988 = vsyncpa [#allocation3], 1 }

</bundles_post_ra>
